<compile_context>
chip_gen: v6e
topology: v6e:2x2x1
jax: 0.10.0
libtpu: 0.0.40
codegen_flags: <defaults>
</compile_context>

<pallas_src>
import functools

import jax
import jax.numpy as jnp
from jax.experimental import pallas as pl
from jax.experimental.pallas import tpu as pltpu


def _patch_merge_kernel(x_ref, we_ref, wo_ref, b_ref, o_ref):
    """Fused 2x2-merge + LayerNorm + Linear for a tile of output rows.

    x_ref : (TH, 2, Wo, 2C)  pairs of input rows; lane dim already holds
                             [x0|x2] (even input row) / [x1|x3] (odd input row)
    we_ref: (2C, Np)         folded weight for the even-row half (gamma folded)
    wo_ref: (2C, Np)         folded weight for the odd-row half
    b_ref : (1, Np)          folded bias (beta @ W.T), float32
    o_ref : (TH, Wo, Np)
    """
    th, _, wo, c2 = x_ref.shape
    m = th * wo
    inv_4c = 1.0 / (2 * c2)          # 1 / (4*C)

    xb = x_ref[...].astype(jnp.float32)          # (TH, 2, Wo, 2C)
    xe = xb[:, 0, :, :].reshape(m, c2)           # [x0 | x2]
    xo = xb[:, 1, :, :].reshape(m, c2)           # [x1 | x3]

    # LayerNorm statistics over the (virtual) 4C-wide concat [x0,x1,x2,x3].
    mean = (jnp.sum(xe, axis=-1, keepdims=True)
            + jnp.sum(xo, axis=-1, keepdims=True)) * inv_4c
    xec = xe - mean
    xoc = xo - mean
    var = (jnp.sum(xec * xec, axis=-1, keepdims=True)
           + jnp.sum(xoc * xoc, axis=-1, keepdims=True)) * inv_4c
    inv = jax.lax.rsqrt(var + 1e-5)              # torch LayerNorm eps

    mm_dtype = we_ref.dtype                      # bf16 (default) or f32
    y = jnp.dot((xec * inv).astype(mm_dtype), we_ref[...],
                preferred_element_type=jnp.float32)
    y = y + jnp.dot((xoc * inv).astype(mm_dtype), wo_ref[...],
                    preferred_element_type=jnp.float32)
    y = y + b_ref[...]                           # f32 bias

    o_ref[...] = y.reshape(th, wo, y.shape[-1]).astype(o_ref.dtype)


def patch_merging_forward(x, H, W, gamma, beta, w_reduction, *,
                          matmul_dtype=jnp.bfloat16,
                          token_tile=1024,
                          vmem_budget_bytes=20 * 1024 * 1024):
    """Pallas implementation of PatchMerging.forward.

    x:           (B, H*W, C)
    gamma, beta: (4C,)        LayerNorm affine params
    w_reduction: (2C, 4C)     torch nn.Linear weight (out_features, in_features)
    returns:     (B, Ho*Wo, 2C) with Ho = ceil(H/2), Wo = ceil(W/2)
    """
    B, L, C = x.shape
    assert L == H * W, "input feature has wrong size"

    xv = x.reshape(B, H, W, C)
    pad_h, pad_w = H % 2, W % 2
    if pad_h or pad_w:                           # torch F.pad bottom/right zeros
        xv = jnp.pad(xv, ((0, 0), (0, pad_h), (0, pad_w), (0, 0)))
    Ho, Wo = (H + pad_h) // 2, (W + pad_w) // 2
    C2, C4 = 2 * C, 4 * C
    BH = B * Ho

    # Free, contiguous reshape: input row 2*ho   -> per wo: [x0 | x2]
    #                           input row 2*ho+1 -> per wo: [x1 | x3]
    x5 = xv.reshape(BH, 2, Wo, C2)

    # Lane-dense output width (multiple of 128); padding sliced off afterwards.
    Np = C2 if C2 % 128 == 0 else ((C2 + 127) // 128) * 128

    # Fold LayerNorm affine into the reduction weight / bias (f32, exact).
    wt = w_reduction.astype(jnp.float32).T                      # (4C, 2C)
    bias = beta.astype(jnp.float32) @ wt                        # (2C,)
    wg = gamma.astype(jnp.float32)[:, None] * wt                # (4C, 2C)
    w_even = jnp.concatenate([wg[:C], wg[2 * C:3 * C]], axis=0)  # rows of [x0|x2]
    w_odd = jnp.concatenate([wg[C:2 * C], wg[3 * C:]], axis=0)   # rows of [x1|x3]
    if Np != C2:
        w_even = jnp.pad(w_even, ((0, 0), (0, Np - C2)))
        w_odd = jnp.pad(w_odd, ((0, 0), (0, Np - C2)))
        bias = jnp.pad(bias, (0, Np - C2))
    w_even = w_even.astype(matmul_dtype)
    w_odd = w_odd.astype(matmul_dtype)
    bias2d = bias.reshape(1, Np)                                # stays f32

    # Row-pair tile: ~token_tile output tokens per grid step, capped by a VMEM
    # budget (the pipeline double-buffers every block).
    x_bytes = jnp.dtype(x.dtype).itemsize
    w_bytes = jnp.dtype(matmul_dtype).itemsize
    o_bytes = jnp.dtype(x.dtype).itemsize
    fixed = 2 * (2 * C2 * Np * w_bytes + Np * 4)                 # weights + bias
    per_th = 2 * (2 * Wo * C2 * x_bytes + Wo * Np * o_bytes)     # x + out per row
    th = max(1, min(BH, -(-token_tile // Wo)))
    budget_th = (vmem_budget_bytes - fixed) // per_th
    th = max(1, min(th, budget_th)) if budget_th >= 1 else 1

    tokens = BH * Wo
    cost = pl.CostEstimate(
        flops=2 * tokens * C4 * Np,
        transcendentals=tokens,
        bytes_accessed=(tokens * C4 * x_bytes + tokens * Np * o_bytes
                        + 2 * C2 * Np * w_bytes + Np * 4))

    out = pl.pallas_call(
        _patch_merge_kernel,
        out_shape=jax.ShapeDtypeStruct((BH, Wo, Np), x.dtype),
        grid_spec=pltpu.PrefetchScalarGridSpec(
            num_scalar_prefetch=0,
            grid=(pl.cdiv(BH, th),),
            in_specs=[
                pl.BlockSpec((th, 2, Wo, C2), lambda i: (i, 0, 0, 0)),
                pl.BlockSpec((C2, Np), lambda i: (0, 0)),
                pl.BlockSpec((C2, Np), lambda i: (0, 0)),
                pl.BlockSpec((1, Np), lambda i: (0, 0)),
            ],
            out_specs=pl.BlockSpec((th, Wo, Np), lambda i: (i, 0, 0)),
        ),
        compiler_params=pltpu.CompilerParams(
            dimension_semantics=("parallel",),
            vmem_limit_bytes=40 * 1024 * 1024),
        cost_estimate=cost,
    )(x5, w_even, w_odd, bias2d)

    if Np != C2:
        out = out[..., :C2]
    return out.reshape(B, Ho * Wo, C2)


def _reference(x, H, W, gamma, beta, w_reduction):
    """Pure-JAX reference matching the PyTorch module."""
    B, L, C = x.shape
    xv = x.reshape(B, H, W, C)
    pad_h, pad_w = H % 2, W % 2
    if pad_h or pad_w:
        xv = jnp.pad(xv, ((0, 0), (0, pad_h), (0, pad_w), (0, 0)))
    x0 = xv[:, 0::2, 0::2, :]
    x1 = xv[:, 1::2, 0::2, :]
    x2 = xv[:, 0::2, 1::2, :]
    x3 = xv[:, 1::2, 1::2, :]
    xm = jnp.concatenate([x0, x1, x2, x3], axis=-1).reshape(B, -1, 4 * C)
    mean = jnp.mean(xm, axis=-1, keepdims=True)
    var = jnp.mean((xm - mean) ** 2, axis=-1, keepdims=True)
    xn = (xm - mean) * jax.lax.rsqrt(var + 1e-5) * gamma + beta
    return jnp.einsum("blk,ok->blo", xn, w_reduction)


if __name__ == "__main__":
    # Small shapes consistent with the module: dim=C=4, H=W=16, B=2.
    B, C, H, W = 2, 4, 16, 16
    key = jax.random.PRNGKey(0)
    kx, kg, kb, kw = jax.random.split(key, 4)

    x = jax.random.normal(kx, (B, H * W, C), dtype=jnp.float32)
    gamma = 1.0 + 0.1 * jax.random.normal(kg, (4 * C,), dtype=jnp.float32)
    beta = 0.1 * jax.random.normal(kb, (4 * C,), dtype=jnp.float32)
    w_reduction = (jax.random.normal(kw, (2 * C, 4 * C), dtype=jnp.float32)
                   / jnp.sqrt(4.0 * C))

    ref = _reference(x, H, W, gamma, beta, w_reduction)

    # Default (bf16 MXU operands, f32 stats/accumulation).
    fwd = jax.jit(functools.partial(patch_merging_forward, H=H, W=W))
    out = jax.block_until_ready(
        fwd(x, gamma=gamma, beta=beta, w_reduction=w_reduction))
    assert out.shape == (B, (H // 2) * (W // 2), 2 * C), out.shape
    assert jnp.allclose(out, ref, atol=5e-2, rtol=5e-2), "bf16 path mismatch"

    # Full-f32 matmul path for a tight numerical check of the fused math.
    fwd32 = jax.jit(functools.partial(patch_merging_forward, H=H, W=W,
                                      matmul_dtype=jnp.float32))
    out32 = jax.block_until_ready(
        fwd32(x, gamma=gamma, beta=beta, w_reduction=w_reduction))
    assert jnp.allclose(out32, ref, atol=1e-4, rtol=1e-4), "f32 path mismatch"

    print("KERNEL_OK")
</pallas_src>

<mosaic_0001>
module attributes {stable_mosaic.version = 11 : i64} {
  func.func @_patch_merge_kernel(%arg0: i32, %arg1: memref<16x2x8x8xf32, #tpu.memory_space<vmem>>, %arg2: memref<8x128xbf16, #tpu.memory_space<vmem>>, %arg3: memref<8x128xbf16, #tpu.memory_space<vmem>>, %arg4: memref<1x128xf32, #tpu.memory_space<vmem>>, %arg5: memref<16x8x128xf32, #tpu.memory_space<vmem>>) attributes {dimension_semantics = [#tpu.dimension_semantics<parallel>], iteration_bounds = array<i64: 1>, scalar_prefetch = 0 : i64, scratch_operands = 0 : i64, tpu.core_type = #tpu.core_type<tc>, window_params = [{transform_indices = @transform_0, window_bounds = array<i64: 16, 2, 8, 8>}, {pipeline_mode = #tpu.pipeline_mode<synchronous>, transform_indices = @transform_1, window_bounds = array<i64: 8, 128>}, {pipeline_mode = #tpu.pipeline_mode<synchronous>, transform_indices = @transform_2, window_bounds = array<i64: 8, 128>}, {pipeline_mode = #tpu.pipeline_mode<synchronous>, transform_indices = @transform_3, window_bounds = array<i64: 1, 128>}, {transform_indices = @transform_4, window_bounds = array<i64: 16, 8, 128>}]} {
    %c0 = arith.constant 0 : index
    %c0_0 = arith.constant 0 : index
    %c0_1 = arith.constant 0 : index
    %c0_2 = arith.constant 0 : index
    %0 = vector.load %arg1[%c0, %c0_0, %c0_1, %c0_2] : memref<16x2x8x8xf32, #tpu.memory_space<vmem>>, vector<16x2x8x8xf32>
    %1 = vector.extract_strided_slice %0 {offsets = [0, 0, 0, 0], sizes = [16, 1, 8, 8], strides = [1, 1, 1, 1]} : vector<16x2x8x8xf32> to vector<16x1x8x8xf32>
    %2 = vector.shape_cast %1 : vector<16x1x8x8xf32> to vector<16x8x8xf32>
    %3 = vector.shape_cast %2 : vector<16x8x8xf32> to vector<128x8xf32>
    %4 = vector.extract_strided_slice %0 {offsets = [0, 1, 0, 0], sizes = [16, 1, 8, 8], strides = [1, 1, 1, 1]} : vector<16x2x8x8xf32> to vector<16x1x8x8xf32>
    %5 = vector.shape_cast %4 : vector<16x1x8x8xf32> to vector<16x8x8xf32>
    %6 = vector.shape_cast %5 : vector<16x8x8xf32> to vector<128x8xf32>
    %cst = arith.constant dense<0.000000e+00> : vector<128xf32>
    %7 = vector.multi_reduction <add>, %3, %cst [1] : vector<128x8xf32> to vector<128xf32>
    %8 = vector.shape_cast %7 : vector<128xf32> to vector<128x1xf32>
    %cst_3 = arith.constant dense<0.000000e+00> : vector<128xf32>
    %9 = vector.multi_reduction <add>, %6, %cst_3 [1] : vector<128x8xf32> to vector<128xf32>
    %10 = vector.shape_cast %9 : vector<128xf32> to vector<128x1xf32>
    %11 = arith.addf %8, %10 : vector<128x1xf32>
    %cst_4 = arith.constant 6.250000e-02 : f32
    %12 = vector.broadcast %cst_4 : f32 to vector<128x1xf32>
    %13 = arith.mulf %11, %12 : vector<128x1xf32>
    %14 = vector.broadcast %13 : vector<128x1xf32> to vector<128x8xf32>
    %15 = arith.subf %3, %14 : vector<128x8xf32>
    %16 = vector.broadcast %13 : vector<128x1xf32> to vector<128x8xf32>
    %17 = arith.subf %6, %16 : vector<128x8xf32>
    %18 = arith.mulf %15, %15 : vector<128x8xf32>
    %cst_5 = arith.constant dense<0.000000e+00> : vector<128xf32>
    %19 = vector.multi_reduction <add>, %18, %cst_5 [1] : vector<128x8xf32> to vector<128xf32>
    %20 = vector.shape_cast %19 : vector<128xf32> to vector<128x1xf32>
    %21 = arith.mulf %17, %17 : vector<128x8xf32>
    %cst_6 = arith.constant dense<0.000000e+00> : vector<128xf32>
    %22 = vector.multi_reduction <add>, %21, %cst_6 [1] : vector<128x8xf32> to vector<128xf32>
    %23 = vector.shape_cast %22 : vector<128xf32> to vector<128x1xf32>
    %24 = arith.addf %20, %23 : vector<128x1xf32>
    %cst_7 = arith.constant 6.250000e-02 : f32
    %25 = vector.broadcast %cst_7 : f32 to vector<128x1xf32>
    %26 = arith.mulf %24, %25 : vector<128x1xf32>
    %cst_8 = arith.constant 9.99999974E-6 : f32
    %27 = vector.broadcast %cst_8 : f32 to vector<128x1xf32>
    %28 = arith.addf %26, %27 : vector<128x1xf32>
    %29 = math.rsqrt %28 : vector<128x1xf32>
    %30 = vector.broadcast %29 : vector<128x1xf32> to vector<128x8xf32>
    %31 = arith.mulf %15, %30 : vector<128x8xf32>
    %32 = arith.truncf %31 : vector<128x8xf32> to vector<128x8xbf16>
    %c0_9 = arith.constant 0 : index
    %c0_10 = arith.constant 0 : index
    %33 = vector.load %arg2[%c0_9, %c0_10] : memref<8x128xbf16, #tpu.memory_space<vmem>>, vector<8x128xbf16>
    %cst_11 = arith.constant dense<0.000000e+00> : vector<128x128xf32>
    %34 = tpu.matmul %32, %33, %cst_11 {dimension_numbers = #tpu.dot_dimension_numbers<[1], [0], [0], [1], [0, 0, 1, 1], [], []>} : vector<128x8xbf16>, vector<8x128xbf16>, vector<128x128xf32> -> vector<128x128xf32>
    %35 = vector.broadcast %29 : vector<128x1xf32> to vector<128x8xf32>
    %36 = arith.mulf %17, %35 : vector<128x8xf32>
    %37 = arith.truncf %36 : vector<128x8xf32> to vector<128x8xbf16>
    %c0_12 = arith.constant 0 : index
    %c0_13 = arith.constant 0 : index
    %38 = vector.load %arg3[%c0_12, %c0_13] : memref<8x128xbf16, #tpu.memory_space<vmem>>, vector<8x128xbf16>
    %cst_14 = arith.constant dense<0.000000e+00> : vector<128x128xf32>
    %39 = tpu.matmul %37, %38, %cst_14 {dimension_numbers = #tpu.dot_dimension_numbers<[1], [0], [0], [1], [0, 0, 1, 1], [], []>} : vector<128x8xbf16>, vector<8x128xbf16>, vector<128x128xf32> -> vector<128x128xf32>
    %40 = arith.addf %34, %39 : vector<128x128xf32>
    %c0_15 = arith.constant 0 : index
    %c0_16 = arith.constant 0 : index
    %41 = vector.load %arg4[%c0_15, %c0_16] : memref<1x128xf32, #tpu.memory_space<vmem>>, vector<1x128xf32>
    %42 = vector.broadcast %41 : vector<1x128xf32> to vector<128x128xf32>
    %43 = arith.addf %40, %42 : vector<128x128xf32>
    %44 = vector.shape_cast %43 : vector<128x128xf32> to vector<16x8x128xf32>
    %c0_17 = arith.constant 0 : index
    %c0_18 = arith.constant 0 : index
    %c0_19 = arith.constant 0 : index
    %45 = vector.load %arg5[%c0_17, %c0_18, %c0_19] : memref<16x8x128xf32, #tpu.memory_space<vmem>>, vector<16x8x128xf32>
    tpu.vector_store %arg5[%c0_17, %c0_18, %c0_19], %44 {strides = array<i32>} : memref<16x8x128xf32, #tpu.memory_space<vmem>>, vector<16x8x128xf32>,
    return
  }
  func.func @transform_0(%arg0: i32) -> (i32, i32, i32, i32) {
    %c0_i32 = arith.constant 0 : i32
    %c0_i32_0 = arith.constant 0 : i32
    %c0_i32_1 = arith.constant 0 : i32
    %c0_i32_2 = arith.constant 0 : i32
    return %arg0, %c0_i32, %c0_i32_0, %c0_i32_1 : i32, i32, i32, i32
  }
  func.func @transform_1(%arg0: i32) -> (i32, i32) {
    %c0_i32 = arith.constant 0 : i32
    %c0_i32_0 = arith.constant 0 : i32
    %c0_i32_1 = arith.constant 0 : i32
    return %c0_i32, %c0_i32_0 : i32, i32
  }
  func.func @transform_2(%arg0: i32) -> (i32, i32) {
    %c0_i32 = arith.constant 0 : i32
    %c0_i32_0 = arith.constant 0 : i32
    %c0_i32_1 = arith.constant 0 : i32
    return %c0_i32, %c0_i32_0 : i32, i32
  }
  func.func @transform_3(%arg0: i32) -> (i32, i32) {
    %c0_i32 = arith.constant 0 : i32
    %c0_i32_0 = arith.constant 0 : i32
    %c0_i32_1 = arith.constant 0 : i32
    return %c0_i32, %c0_i32_0 : i32, i32
  }
  func.func @transform_4(%arg0: i32) -> (i32, i32, i32) {
    %c0_i32 = arith.constant 0 : i32
    %c0_i32_0 = arith.constant 0 : i32
    %c0_i32_1 = arith.constant 0 : i32
    return %arg0, %c0_i32, %c0_i32_0 : i32, i32, i32
  }
}

</mosaic_0001>

<bundles_post_ra>
// kernel: patch_merging_forward.1
= control target key start
LH: loop header
LB: loop body
LE: loop exit
PB: predicated region body
PF: predicated region fallthrough
CT: control target
= control target key end

     0   :  { %vm50_vm0 = vcmask 64512   ;;  %vm477_vm1 = vcmask 1043456   ;;  %s1414_s0 = inlined_call_operand.vmem [shape: f32[16,2,8,8], index: 0, kind: input, shape index: {}]   ;;  %s1415_s2 = inlined_call_operand.vmem [shape: bf16[8,128], index: 2, kind: input, shape index: {}]   ;;  %s1416_s1 = inlined_call_operand.vmem [shape: bf16[8,128], index: 1, kind: input, shape index: {}]   ;;  %s1417_s3 = inlined_call_operand.vmem [shape: f32[1,128], index: 3, kind: input, shape index: {}]   ;;  %s1418_s4 = inlined_call_operand.vmem [shape: f32[16,8,128], index: 4, kind: output, shape index: {}]  }
   0x1   :  { %v878_v0 = vld [vmem:[%s1414_s0 + $0x8] sm:$0xff]  ;;  %v883_v1 = vld [vmem:[%s1414_s0] sm:$0xff]  ;;  %v888_v2 = vld [vmem:[%s1414_s0 + $0x18] sm:$0xff] }
   0x2   :  { %v99_v3 = vsel %vm50_vm0, %v878_v0, 0.0  ;;  %v51_v4 = vsel %vm50_vm0, %v883_v1, 0.0  ;;  %v897_v5 = vld [vmem:[%s1414_s0 + $0x10] sm:$0xff]  ;;  %v102_v6 = vsel %vm50_vm0, %v888_v2, 0.0  ;;  %v911_v9 = vld [vmem:[%s1414_s0 + $0x20] sm:$0xff]  ;;  %v920_v12 = vld [vmem:[%s1414_s0 + $0x38] sm:$0xff] }
   0x3   :  { %100 = vadd.xlane.f32.xlu1 %v99_v3  ;;  %52 = vadd.xlane.f32.xlu0 %v51_v4  ;;  %v54_v7 = vsel %vm50_vm0, %v897_v5, 0.0  ;;  %v906_v8 = vld [vmem:[%s1414_s0 + $0x30] sm:$0xff]  ;;  %v57_v11 = vsel %vm50_vm0, %v911_v9, 0.0  ;;  %v925_v13 = vld [vmem:[%s1414_s0 + $0x28] sm:$0xff]  ;;  %v108_v14 = vsel %vm50_vm0, %v920_v12, 0.0  ;;  %v939_v17 = vld [vmem:[%s1414_s0 + $0x40] sm:$0xff] }
   0x4   :  { %v60_v10 = vsel %vm50_vm0, %v906_v8, 0.0  ;;  %v105_v15 = vsel %vm50_vm0, %v925_v13, 0.0  ;;  %v934_v16 = vld [vmem:[%s1414_s0 + $0x50] sm:$0xff]  ;;  %v63_v19 = vsel %vm50_vm0, %v939_v17, 0.0  ;;  %v948_v20 = vld [vmem:[%s1414_s0 + $0x58] sm:$0xff]  ;;  %v953_v21 = vld [vmem:[%s1414_s0 + $0x48] sm:$0xff] }
   0x5   :  { %v66_v18 = vsel %vm50_vm0, %v934_v16, 0.0  ;;  %v114_v22 = vsel %vm50_vm0, %v948_v20, 0.0  ;;  %v111_v23 = vsel %vm50_vm0, %v953_v21, 0.0  ;;  %v962_v24 = vld [vmem:[%s1414_s0 + $0x70] sm:$0xff]  ;;  %v967_v25 = vld [vmem:[%s1414_s0 + $0x60] sm:$0xff]  ;;  %v976_v28 = vld [vmem:[%s1414_s0 + $0x78] sm:$0xff] }
   0x6   :  { %v72_v26 = vsel %vm50_vm0, %v962_v24, 0.0  ;;  %v69_v27 = vsel %vm50_vm0, %v967_v25, 0.0  ;;  %v981_v29 = vld [vmem:[%s1414_s0 + $0x68] sm:$0xff]  ;;  %v120_v30 = vsel %vm50_vm0, %v976_v28, 0.0  ;;  %v990_v32 = vld [vmem:[%s1414_s0 + $0x90] sm:$0xff]  ;;  %v995_v33 = vld [vmem:[%s1414_s0 + $0x80] sm:$0xff] }
   0x7   :  { %103 = vadd.xlane.f32.xlu1 %v102_v6  ;;  %55 = vadd.xlane.f32.xlu0 %v54_v7  ;;  %v117_v31 = vsel %vm50_vm0, %v981_v29, 0.0  ;;  %v78_v34 = vsel %vm50_vm0, %v990_v32, 0.0  ;;  %v75_v35 = vsel %vm50_vm0, %v995_v33, 0.0  ;;  %v1004_v36 = vld [vmem:[%s1414_s0 + $0x98] sm:$0xff]  ;;  %v1009_v37 = vld [vmem:[%s1414_s0 + $0x88] sm:$0xff]  ;;  %v1018_v40 = vld [vmem:[%s1414_s0 + $0xb0] sm:$0xff] }
   0x8   :  { %v126_v38 = vsel %vm50_vm0, %v1004_v36, 0.0  ;;  %v123_v39 = vsel %vm50_vm0, %v1009_v37, 0.0  ;;  %v1023_v41 = vld [vmem:[%s1414_s0 + $0xa0] sm:$0xff]  ;;  %v84_v42 = vsel %vm50_vm0, %v1018_v40, 0.0  ;;  %v1032_v44 = vld [vmem:[%s1414_s0 + $0xb8] sm:$0xff]  ;;  %v1037_v45 = vld [vmem:[%s1414_s0 + $0xa8] sm:$0xff] }
   0x9   :  { %v81_v43 = vsel %vm50_vm0, %v1023_v41, 0.0  ;;  %v132_v46 = vsel %vm50_vm0, %v1032_v44, 0.0  ;;  %v129_v47 = vsel %vm50_vm0, %v1037_v45, 0.0  ;;  %v1046_v48 = vld [vmem:[%s1414_s0 + $0xd0] sm:$0xff]  ;;  %v1051_v49 = vld [vmem:[%s1414_s0 + $0xc0] sm:$0xff]  ;;  %v1060_v52 = vld [vmem:[%s1414_s0 + $0xd8] sm:$0xff] }
   0xa   :  { %v90_v50 = vsel %vm50_vm0, %v1046_v48, 0.0  ;;  %v87_v51 = vsel %vm50_vm0, %v1051_v49, 0.0  ;;  %v1065_v53 = vld [vmem:[%s1414_s0 + $0xc8] sm:$0xff]  ;;  %v138_v54 = vsel %vm50_vm0, %v1060_v52, 0.0  ;;  %v1074_v56 = vld [vmem:[%s1414_s0 + $0xf0] sm:$0xff]  ;;  %v1079_v57 = vld [vmem:[%s1414_s0 + $0xe0] sm:$0xff] }
   0xb   :  { %61 = vadd.xlane.f32.xlu1 %v60_v10  ;;  %58 = vadd.xlane.f32.xlu0 %v57_v11  ;;  %v135_v55 = vsel %vm50_vm0, %v1065_v53, 0.0  ;;  %v96_v58 = vsel %vm50_vm0, %v1074_v56, 0.0  ;;  %v93_v59 = vsel %vm50_vm0, %v1079_v57, 0.0  ;;  %v1088_v60 = vld [vmem:[%s1414_s0 + $0xf8] sm:$0xff]  ;;  %v1093_v61 = vld [vmem:[%s1414_s0 + $0xe8] sm:$0xff] }
   0xc   :  { %v144_v62 = vsel %vm50_vm0, %v1088_v60, 0.0  ;;  %v141_v63 = vsel %vm50_vm0, %v1093_v61, 0.0 }
   0xf   :  { %109 = vadd.xlane.f32.xlu1 %v108_v14  ;;  %106 = vadd.xlane.f32.xlu0 %v105_v15 }
  0x13   :  { %67 = vadd.xlane.f32.xlu1 %v66_v18  ;;  %64 = vadd.xlane.f32.xlu0 %v63_v19 }
  0x17   :  { %115 = vadd.xlane.f32.xlu1 %v114_v22  ;;  %112 = vadd.xlane.f32.xlu0 %v111_v23 }
  0x1b   :  { %73 = vadd.xlane.f32.xlu1 %v72_v26  ;;  %70 = vadd.xlane.f32.xlu0 %v69_v27 }
  0x1f   :  { %121 = vadd.xlane.f32.xlu1 %v120_v30  ;;  %118 = vadd.xlane.f32.xlu0 %v117_v31 }
  0x23   :  { %79 = vadd.xlane.f32.xlu1 %v78_v34  ;;  %76 = vadd.xlane.f32.xlu0 %v75_v35 }
  0x27   :  { %127 = vadd.xlane.f32.xlu1 %v126_v38  ;;  %124 = vadd.xlane.f32.xlu0 %v123_v39 }
  0x2b   :  { %85 = vadd.xlane.f32.xlu1 %v84_v42  ;;  %82 = vadd.xlane.f32.xlu0 %v81_v43 }
  0x2f   :  { %133 = vadd.xlane.f32.xlu1 %v132_v46  ;;  %130 = vadd.xlane.f32.xlu0 %v129_v47 }
  0x33   :  { %91 = vadd.xlane.f32.xlu1 %v90_v50  ;;  %88 = vadd.xlane.f32.xlu0 %v87_v51 }
  0x37   :  { %139 = vadd.xlane.f32.xlu1 %v138_v54  ;;  %136 = vadd.xlane.f32.xlu0 %v135_v55 }
  0x3b   :  { %97 = vadd.xlane.f32.xlu1 %v96_v58  ;;  %94 = vadd.xlane.f32.xlu0 %v93_v59 }
  0x3f   :  { %145 = vadd.xlane.f32.xlu1 %v144_v62  ;;  %142 = vadd.xlane.f32.xlu0 %v141_v63 }
  0x8c   :  { %v101_v3 = vpop.xlane.xlu1 %100  ;;  %v53_v4 = vpop.xlane.xlu0 %52 }
  0x8d   :  { %v147_v6 = vadd.f32 %v101_v3, %v53_v4 }
  0x8f   :  { %v163_v7 = vmul.f32 0.0625, %v147_v6 }
  0x90   :  { %v104_v10 = vpop.xlane.xlu1 %103  ;;  %v56_v11 = vpop.xlane.xlu0 %55 }
  0x91   :  { %v1100_v14 = vsub.f32 %v883_v1, %v163_v7  ;;  %v1103_v15 = vsub.f32 %v878_v0, %v163_v7  ;;  %v148_v18 = vadd.f32 %v104_v10, %v56_v11 }
  0x93   :  { %v164_v19 = vmul.f32 0.0625, %v148_v18  ;;  %v211_v22 = vmul.f32 %v1100_v14, %v1100_v14  ;;  %v275_v1 = vmul.f32 %v1103_v15, %v1103_v15 }
  0x94   :  { %v62_v23 = vpop.xlane.xlu1 %61  ;;  %v59_v26 = vpop.xlane.xlu0 %58 }
  0x95   :  { %v1108_v27 = vsub.f32 %v897_v5, %v164_v19  ;;  %v1111_v30 = vsub.f32 %v888_v2, %v164_v19  ;;  %v227_v31 = vsel %vm50_vm0, %v211_v22, 0.0  ;;  %v291_v42 = vsel %vm50_vm0, %v275_v1, 0.0 }
  0x96   :  { %228 = vadd.xlane.f32.xlu0 %v227_v31 }
  0x97   :  { %v212_v0 = vmul.f32 %v1108_v27, %v1108_v27  ;;  %v276_v38 = vmul.f32 %v1111_v30, %v1111_v30 }
  0x98   :  { %v110_v34 = vpop.xlane.xlu1 %109  ;;  %v107_v35 = vpop.xlane.xlu0 %106 }
  0x99   :  { %v150_v39 = vadd.f32 %v110_v34, %v62_v23  ;;  %v149_v5 = vadd.f32 %v107_v35, %v59_v26  ;;  %v230_v2 = vsel %vm50_vm0, %v212_v0, 0.0  ;;  %v294_v51 = vsel %vm50_vm0, %v276_v38, 0.0 }
  0x9a   :  { %292 = vadd.xlane.f32.xlu0 %v291_v42  ;;  %231 = vadd.xlane.f32.xlu1 %v230_v2 }
  0x9b   :  { %v166_v43 = vmul.f32 0.0625, %v150_v39  ;;  %v165_v46 = vmul.f32 0.0625, %v149_v5 }
  0x9c   :  { %v68_v47 = vpop.xlane.xlu1 %67  ;;  %v65_v50 = vpop.xlane.xlu0 %64 }
  0x9d   :  { %v1124_v54 = vsub.f32 %v906_v8, %v166_v43  ;;  %v1127_v55 = vsub.f32 %v920_v12, %v166_v43  ;;  %v1130_v58 = vsub.f32 %v911_v9, %v165_v46  ;;  %v1133_v59 = vsub.f32 %v925_v13, %v165_v46 }
  0x9e   :  { %295 = vadd.xlane.f32.xlu1 %v294_v51 }
  0x9f   :  { %v214_v62 = vmul.f32 %v1124_v54, %v1124_v54  ;;  %v213_v63 = vmul.f32 %v1130_v58, %v1130_v58  ;;  %v278_v8 = vmul.f32 %v1127_v55, %v1127_v55  ;;  %v277_v12 = vmul.f32 %v1133_v59, %v1133_v59 }
  0xa0   :  { %v116_v3 = vpop.xlane.xlu1 %115  ;;  %v113_v4 = vpop.xlane.xlu0 %112 }
  0xa1   :  { %v152_v9 = vadd.f32 %v116_v3, %v68_v47  ;;  %v151_v6 = vadd.f32 %v113_v4, %v65_v50  ;;  %v236_v13 = vsel %vm50_vm0, %v214_v62, 0.0  ;;  %v233_v7 = vsel %vm50_vm0, %v213_v63, 0.0 }
  0xa2   :  { %237 = vadd.xlane.f32.xlu1 %v236_v13  ;;  %234 = vadd.xlane.f32.xlu0 %v233_v7  ;;  %v300_v22 = vsel %vm50_vm0, %v278_v8, 0.0  ;;  %v297_v23 = vsel %vm50_vm0, %v277_v12, 0.0 }
  0xa3   :  { %v168_v10 = vmul.f32 0.0625, %v152_v9  ;;  %v167_v11 = vmul.f32 0.0625, %v151_v6 }
  0xa4   :  { %v74_v18 = vpop.xlane.xlu1 %73  ;;  %v71_v19 = vpop.xlane.xlu0 %70 }
  0xa5   :  { %v1148_v26 = vsub.f32 %v934_v16, %v168_v10  ;;  %v1151_v31 = vsub.f32 %v948_v20, %v168_v10  ;;  %v1154_v1 = vsub.f32 %v939_v17, %v167_v11  ;;  %v1157_v0 = vsub.f32 %v953_v21, %v167_v11 }
  0xa6   :  { %301 = vadd.xlane.f32.xlu1 %v300_v22  ;;  %298 = vadd.xlane.f32.xlu0 %v297_v23 }
  0xa7   :  { %v216_v34 = vmul.f32 %v1148_v26, %v1148_v26  ;;  %v215_v35 = vmul.f32 %v1154_v1, %v1154_v1  ;;  %v280_v20 = vmul.f32 %v1151_v31, %v1151_v31  ;;  %v279_v17 = vmul.f32 %v1157_v0, %v1157_v0 }
  0xa8   :  { %v122_v38 = vpop.xlane.xlu1 %121  ;;  %v119_v16 = vpop.xlane.xlu0 %118 }
  0xa9   :  { %v154_v39 = vadd.f32 %v122_v38, %v74_v18  ;;  %v153_v5 = vadd.f32 %v119_v16, %v71_v19  ;;  %v242_v21 = vsel %vm50_vm0, %v216_v34, 0.0  ;;  %v239_v42 = vsel %vm50_vm0, %v215_v35, 0.0 }
  0xaa   :  { %243 = vadd.xlane.f32.xlu1 %v242_v21  ;;  %240 = vadd.xlane.f32.xlu0 %v239_v42  ;;  %v306_v50 = vsel %vm50_vm0, %v280_v20, 0.0  ;;  %v303_v51 = vsel %vm50_vm0, %v279_v17, 0.0 }
  0xab   :  { %v170_v2 = vmul.f32 0.0625, %v154_v39  ;;  %v169_v43 = vmul.f32 0.0625, %v153_v5 }
  0xac   :  { %v80_v46 = vpop.xlane.xlu1 %79  ;;  %v77_v47 = vpop.xlane.xlu0 %76 }
  0xad   :  { %v1172_v62 = vsub.f32 %v962_v24, %v170_v2  ;;  %v1175_v63 = vsub.f32 %v976_v28, %v170_v2  ;;  %v1178_v3 = vsub.f32 %v967_v25, %v169_v43  ;;  %v1181_v4 = vsub.f32 %v981_v29, %v169_v43 }
  0xae   :  { %307 = vadd.xlane.f32.xlu1 %v306_v50  ;;  %304 = vadd.xlane.f32.xlu0 %v303_v51 }
  0xaf   :  { %v218_v8 = vmul.f32 %v1172_v62, %v1172_v62  ;;  %v217_v12 = vmul.f32 %v1178_v3, %v1178_v3  ;;  %v282_v28 = vmul.f32 %v1175_v63, %v1175_v63  ;;  %v281_v25 = vmul.f32 %v1181_v4, %v1181_v4 }
  0xb0   :  { %v128_v9 = vpop.xlane.xlu1 %127  ;;  %v125_v24 = vpop.xlane.xlu0 %124 }
  0xb1   :  { %v156_v6 = vadd.f32 %v128_v9, %v80_v46  ;;  %v155_v13 = vadd.f32 %v125_v24, %v77_v47  ;;  %v248_v29 = vsel %vm50_vm0, %v218_v8, 0.0  ;;  %v245_v7 = vsel %vm50_vm0, %v217_v12, 0.0 }
  0xb2   :  { %249 = vadd.xlane.f32.xlu1 %v248_v29  ;;  %246 = vadd.xlane.f32.xlu0 %v245_v7  ;;  %v312_v22 = vsel %vm50_vm0, %v282_v28, 0.0  ;;  %v309_v23 = vsel %vm50_vm0, %v281_v25, 0.0 }
  0xb3   :  { %v172_v10 = vmul.f32 0.0625, %v156_v6  ;;  %v171_v11 = vmul.f32 0.0625, %v155_v13 }
  0xb4   :  { %v86_v18 = vpop.xlane.xlu1 %85  ;;  %v83_v19 = vpop.xlane.xlu0 %82 }
  0xb5   :  { %v1196_v34 = vsub.f32 %v990_v32, %v172_v10  ;;  %v1199_v35 = vsub.f32 %v1004_v36, %v172_v10  ;;  %v1202_v38 = vsub.f32 %v995_v33, %v171_v11  ;;  %v1205_v16 = vsub.f32 %v1009_v37, %v171_v11 }
  0xb6   :  { %313 = vadd.xlane.f32.xlu1 %v312_v22  ;;  %310 = vadd.xlane.f32.xlu0 %v309_v23 }
  0xb7   :  { %v220_v20 = vmul.f32 %v1196_v34, %v1196_v34  ;;  %v219_v17 = vmul.f32 %v1202_v38, %v1202_v38  ;;  %v284_v36 = vmul.f32 %v1199_v35, %v1199_v35  ;;  %v283_v33 = vmul.f32 %v1205_v16, %v1205_v16 }
  0xb8   :  { %v134_v39 = vpop.xlane.xlu1 %133  ;;  %v131_v32 = vpop.xlane.xlu0 %130 }
  0xb9   :  { %v158_v5 = vadd.f32 %v134_v39, %v86_v18  ;;  %v157_v21 = vadd.f32 %v131_v32, %v83_v19  ;;  %v254_v37 = vsel %vm50_vm0, %v220_v20, 0.0  ;;  %v251_v42 = vsel %vm50_vm0, %v219_v17, 0.0  ;;  %v452_v20 = vld [vmem:[%s1415_s2] sm:$0xf] }
  0xba   :  { %255 = vadd.xlane.f32.xlu1 %v254_v37  ;;  %252 = vadd.xlane.f32.xlu0 %v251_v42  ;;  %v318_v50 = vsel %vm50_vm0, %v284_v36, 0.0  ;;  %v315_v51 = vsel %vm50_vm0, %v283_v33, 0.0  ;;  %v427_v17 = vld [vmem:[%s1416_s1] sm:$0xf] }
  0xbb   :  { %v174_v2 = vmul.f32 0.0625, %v158_v5  ;;  %v173_v43 = vmul.f32 0.0625, %v157_v21  ;;  %816 = vmatprep.subr.msk.bf16.mxu0 %vm477_vm1, %v452_v20  ;;  %v479_v5 = vsel %vm477_vm1, %v452_v20, 0  ;;  %v603_v21 = vsel %vm477_vm1, %v427_v17, 0  ;;  %817 = vmatprep.subr.msk.bf16.mxu1 %vm477_vm1, %v427_v17 }
  0xbc   :  { %v92_v46 = vpop.xlane.xlu1 %91  ;;  %v89_v47 = vpop.xlane.xlu0 %88  ;;  %781 = vmatpush3.bf16.msra.mxu0 %v479_v5  ;;  %799 = vmatpush3.bf16.msra.mxu1 %v603_v21 }
  0xbd   :  { %v1220_v8 = vsub.f32 %v1018_v40, %v174_v2  ;;  %v1223_v12 = vsub.f32 %v1032_v44, %v174_v2  ;;  %v1226_v9 = vsub.f32 %v1023_v41, %v173_v43  ;;  %v1229_v24 = vsub.f32 %v1037_v45, %v173_v43 }
  0xbe   :  { %319 = vadd.xlane.f32.xlu1 %v318_v50  ;;  %316 = vadd.xlane.f32.xlu0 %v315_v51 }
  0xbf   :  { %v222_v28 = vmul.f32 %v1220_v8, %v1220_v8  ;;  %v221_v25 = vmul.f32 %v1226_v9, %v1226_v9  ;;  %v286_v40 = vmul.f32 %v1223_v12, %v1223_v12  ;;  %v285_v41 = vmul.f32 %v1229_v24, %v1229_v24 }
  0xc0   :  { %v140_v6 = vpop.xlane.xlu1 %139  ;;  %v137_v44 = vpop.xlane.xlu0 %136 }
  0xc1   :  { %v160_v13 = vadd.f32 %v140_v6, %v92_v46  ;;  %v159_v29 = vadd.f32 %v137_v44, %v89_v47  ;;  %v260_v45 = vsel %vm50_vm0, %v222_v28, 0.0  ;;  %v257_v7 = vsel %vm50_vm0, %v221_v25, 0.0 }
  0xc2   :  { %261 = vadd.xlane.f32.xlu1 %v260_v45  ;;  %258 = vadd.xlane.f32.xlu0 %v257_v7  ;;  %v324_v18 = vsel %vm50_vm0, %v286_v40, 0.0  ;;  %v321_v23 = vsel %vm50_vm0, %v285_v41, 0.0 }
  0xc3   :  { %v176_v10 = vmul.f32 0.0625, %v160_v13  ;;  %v175_v11 = vmul.f32 0.0625, %v159_v29 }
  0xc4   :  { %v98_v19 = vpop.xlane.xlu1 %97  ;;  %v95_v22 = vpop.xlane.xlu0 %94 }
  0xc5   :  { %v1250_v39 = vsub.f32 %v1046_v48, %v176_v10  ;;  %v1253_v32 = vsub.f32 %v1060_v52, %v176_v10  ;;  %v1256_v36 = vsub.f32 %v1051_v49, %v175_v11  ;;  %v1259_v33 = vsub.f32 %v1065_v53, %v175_v11 }
  0xc6   :  { %325 = vadd.xlane.f32.xlu1 %v324_v18  ;;  %322 = vadd.xlane.f32.xlu0 %v321_v23 }
  0xc7   :  { %v224_v37 = vmul.f32 %v1250_v39, %v1250_v39  ;;  %v223_v48 = vmul.f32 %v1256_v36, %v1256_v36  ;;  %v288_v49 = vmul.f32 %v1253_v32, %v1253_v32  ;;  %v287_v53 = vmul.f32 %v1259_v33, %v1259_v33 }
  0xc8   :  { %v146_v52 = vpop.xlane.xlu1 %145  ;;  %v143_v42 = vpop.xlane.xlu0 %142 }
  0xc9   :  { %v162_v2 = vadd.f32 %v146_v52, %v98_v19  ;;  %v161_v43 = vadd.f32 %v143_v42, %v95_v22  ;;  %v266_v46 = vsel %vm50_vm0, %v224_v37, 0.0  ;;  %v263_v47 = vsel %vm50_vm0, %v223_v48, 0.0 }
  0xca   :  { %267 = vadd.xlane.f32.xlu1 %v266_v46  ;;  %264 = vadd.xlane.f32.xlu0 %v263_v47  ;;  %v330_v28 = vsel %vm50_vm0, %v288_v49, 0.0  ;;  %v327_v25 = vsel %vm50_vm0, %v287_v53, 0.0 }
  0xcb   :  { %v178_v50 = vmul.f32 0.0625, %v162_v2  ;;  %v177_v51 = vmul.f32 0.0625, %v161_v43 }
  0xcd   :  { %v1274_v40 = vsub.f32 %v1074_v56, %v178_v50  ;;  %v1277_v6 = vsub.f32 %v1088_v60, %v178_v50  ;;  %v1280_v44 = vsub.f32 %v1079_v57, %v177_v51  ;;  %v1283_v41 = vsub.f32 %v1093_v61, %v177_v51 }
  0xce   :  { %331 = vadd.xlane.f32.xlu1 %v330_v28  ;;  %328 = vadd.xlane.f32.xlu0 %v327_v25 }
  0xcf   :  { %v226_v13 = vmul.f32 %v1274_v40, %v1274_v40  ;;  %v225_v29 = vmul.f32 %v1280_v44, %v1280_v44  ;;  %v290_v60 = vmul.f32 %v1277_v6, %v1277_v6  ;;  %v289_v57 = vmul.f32 %v1283_v41, %v1283_v41 }
  0xd1   :  { %v272_v56 = vsel %vm50_vm0, %v226_v13, 0.0  ;;  %v269_v45 = vsel %vm50_vm0, %v225_v29, 0.0  ;;  %v336_v61 = vsel %vm50_vm0, %v290_v60, 0.0  ;;  %v333_v7 = vsel %vm50_vm0, %v289_v57, 0.0 }
  0xd2   :  { %273 = vadd.xlane.f32.xlu1 %v272_v56  ;;  %270 = vadd.xlane.f32.xlu0 %v269_v45 }
  0xd6   :  { %337 = vadd.xlane.f32.xlu1 %v336_v61  ;;  %334 = vadd.xlane.f32.xlu0 %v333_v7 }
 0x11f   :  { %v229_v10 = vpop.xlane.xlu0 %228 }
 0x123   :  { %v232_v11 = vpop.xlane.xlu1 %231  ;;  %v293_v18 = vpop.xlane.xlu0 %292 }
 0x124   :  { %v339_v19 = vadd.f32 %v293_v18, %v229_v10 }
 0x126   :  { %v355_v22 = vmul.f32 0.0625, %v339_v19 }
 0x127   :  { %v296_v23 = vpop.xlane.xlu1 %295 }
 0x128   :  { %v371_v20 = vadd.f32 1e-05, %v355_v22  ;;  %v340_v17 = vadd.f32 %v296_v23, %v232_v11 }
 0x12a   :  { %v356_v5 = vmul.f32 0.0625, %v340_v17  ;;  %818 = vrsqrt.f32 %v371_v20 }
 0x12b   :  { %v238_v21 = vpop.xlane.xlu1 %237  ;;  %v235_v37 = vpop.xlane.xlu0 %234 }
 0x12c   :  { %v372_v48 = vadd.f32 1e-05, %v356_v5 }
 0x12e   :  { %820 = vrsqrt.f32 %v372_v48 }
 0x12f   :  { %v302_v52 = vpop.xlane.xlu1 %301  ;;  %v299_v42 = vpop.xlane.xlu0 %298 }
 0x130   :  { %v342_v49 = vadd.f32 %v302_v52, %v238_v21  ;;  %v341_v53 = vadd.f32 %v299_v42, %v235_v37 }
 0x132   :  { %v358_v2 = vmul.f32 0.0625, %v342_v49  ;;  %v357_v43 = vmul.f32 0.0625, %v341_v53 }
 0x133   :  { %v244_v46 = vpop.xlane.xlu1 %243  ;;  %v241_v47 = vpop.xlane.xlu0 %240 }
 0x134   :  { %v374_v50 = vadd.f32 1e-05, %v358_v2  ;;  %v373_v51 = vadd.f32 1e-05, %v357_v43 }
 0x136   :  { %822 = vrsqrt.f32 %v374_v50 }
 0x137   :  { %824 = vrsqrt.f32 %v373_v51  ;;  %v308_v28 = vpop.xlane.xlu1 %307  ;;  %v305_v25 = vpop.xlane.xlu0 %304 }
 0x138   :  { %v819_v13 = vpop.eup %818  ;;  %v344_v29 = vadd.f32 %v308_v28, %v244_v46  ;;  %v343_v56 = vadd.f32 %v305_v25, %v241_v47 }
 0x139   :  { %v428_v10 = vmul.f32 %v819_v13, %v1103_v15  ;;  %v403_v11 = vmul.f32 %v819_v13, %v1100_v14 }
 0x13a   :  { %v360_v45 = vmul.f32 0.0625, %v344_v29  ;;  %v359_v60 = vmul.f32 0.0625, %v343_v56 }
 0x13b   :  { %v821_v57 = vpop.eup %820  ;;  %v250_v61 = vpop.xlane.xlu1 %249 }
 0x13c   :  { %v247_v7 = vpop.xlane.xlu0 %246  ;;  %v376_v18 = vadd.f32 1e-05, %v360_v45  ;;  %v375_v19 = vadd.f32 1e-05, %v359_v60  ;;  %v429_v22 = vmul.f32 %v821_v57, %v1111_v30  ;;  %v404_v23 = vmul.f32 %v821_v57, %v1108_v27 }
 0x13e   :  { %826 = vrsqrt.f32 %v376_v18  ;;  %v444_v20 = vpack.c.bf16 %v429_v22, %v428_v10  ;;  %v419_v17 = vpack.c.bf16 %v404_v23, %v403_v11 }
 0x13f   :  { %828 = vrsqrt.f32 %v375_v19  ;;  %v314_v5 = vpop.xlane.xlu1 %313 }
 0x140   :  { %v311_v21 = vpop.xlane.xlu0 %310  ;;  %v346_v37 = vadd.f32 %v314_v5, %v250_v61  ;;  %782 = vmatprep.mubr.msk.bf16.mxu0 %vm50_vm0, %v444_v20  ;;  %800 = vmatprep.mubr.msk.bf16.mxu1 %vm50_vm0, %v419_v17 }
 0x141   :  { %v345_v48 = vadd.f32 %v311_v21, %v247_v7 }
 0x142   :  { %v362_v15 = vmul.f32 0.0625, %v346_v37 }
 0x143   :  { %v361_v14 = vmul.f32 0.0625, %v345_v48  ;;  %v823_v52 = vpop.eup %822  ;;  %v256_v42 = vpop.xlane.xlu1 %255 }
 0x144   :  { %v253_v49 = vpop.xlane.xlu0 %252  ;;  %v825_v30 = vpop.eup %824  ;;  %v378_v53 = vadd.f32 1e-05, %v362_v15  ;;  %v431_v2 = vmul.f32 %v823_v52, %v1127_v55  ;;  %v406_v43 = vmul.f32 %v823_v52, %v1124_v54 }
 0x145   :  { %v377_v27 = vadd.f32 1e-05, %v361_v14  ;;  %v430_v46 = vmul.f32 %v825_v30, %v1133_v59  ;;  %v405_v47 = vmul.f32 %v825_v30, %v1130_v58 }
 0x146   :  { %830 = vrsqrt.f32 %v378_v53 }
 0x147   :  { %832 = vrsqrt.f32 %v377_v27  ;;  %v320_v50 = vpop.xlane.xlu1 %319  ;;  %v445_v28 = vpack.c.bf16 %v431_v2, %v430_v46  ;;  %v420_v25 = vpack.c.bf16 %v406_v43, %v405_v47 }
 0x148   :  { %v317_v51 = vpop.xlane.xlu0 %316  ;;  %v348_v13 = vadd.f32 %v320_v50, %v256_v42 }
 0x149   :  { %v347_v29 = vadd.f32 %v317_v51, %v253_v49  ;;  %783 = vmatmul.mubr.msk.bf16.vlgmr.msra.gmra.mxu0 %vm50_vm0, %v445_v28  ;;  %801 = vmatmul.mubr.msk.bf16.vlgmr.msra.gmra.mxu1 %vm50_vm0, %v420_v25 }
 0x14a   :  { %v364_v56 = vmul.f32 0.0625, %v348_v13 }
 0x14b   :  { %v363_v55 = vmul.f32 0.0625, %v347_v29  ;;  %v827_v45 = vpop.eup %826  ;;  %v262_v54 = vpop.xlane.xlu1 %261 }
 0x14c   :  { %v259_v60 = vpop.xlane.xlu0 %258  ;;  %v829_v59 = vpop.eup %828  ;;  %v380_v57 = vadd.f32 1e-05, %v364_v56  ;;  %v433_v61 = vmul.f32 %v827_v45, %v1151_v31  ;;  %v408_v7 = vmul.f32 %v827_v45, %v1148_v26 }
 0x14d   :  { %v379_v58 = vadd.f32 1e-05, %v363_v55  ;;  %v432_v10 = vmul.f32 %v829_v59, %v1157_v0  ;;  %v407_v11 = vmul.f32 %v829_v59, %v1154_v1 }
 0x14e   :  { %834 = vrsqrt.f32 %v380_v57 }
 0x14f   :  { %836 = vrsqrt.f32 %v379_v58  ;;  %v326_v18 = vpop.xlane.xlu1 %325  ;;  %v446_v22 = vpack.c.bf16 %v433_v61, %v432_v10  ;;  %v421_v23 = vpack.c.bf16 %v408_v7, %v407_v11 }
 0x150   :  { %v323_v19 = vpop.xlane.xlu0 %322  ;;  %v350_v20 = vadd.f32 %v326_v18, %v262_v54 }
 0x151   :  { %v349_v17 = vadd.f32 %v323_v19, %v259_v60  ;;  %786 = vmatprep.mubr.msk.bf16.mxu0 %vm50_vm0, %v446_v22  ;;  %804 = vmatprep.mubr.msk.bf16.mxu1 %vm50_vm0, %v421_v23 }
 0x152   :  { %v366_v5 = vmul.f32 0.0625, %v350_v20 }
 0x153   :  { %v365_v31 = vmul.f32 0.0625, %v349_v17  ;;  %v831_v21 = vpop.eup %830  ;;  %v268_v26 = vpop.xlane.xlu1 %267 }
 0x154   :  { %v265_v37 = vpop.xlane.xlu0 %264  ;;  %v833_v0 = vpop.eup %832  ;;  %v382_v48 = vadd.f32 1e-05, %v366_v5  ;;  %v435_v15 = vmul.f32 %v831_v21, %v1175_v63  ;;  %v410_v14 = vmul.f32 %v831_v21, %v1172_v62 }
 0x155   :  { %v381_v1 = vadd.f32 1e-05, %v365_v31  ;;  %v434_v52 = vmul.f32 %v833_v0, %v1181_v4  ;;  %v409_v42 = vmul.f32 %v833_v0, %v1178_v3 }
 0x156   :  { %838 = vrsqrt.f32 %v382_v48  ;;  %v1348_v48 = vld [vmem:[%s1417_s3] ss:$0 sm:$0xff] }
 0x157   :  { %840 = vrsqrt.f32 %v381_v1  ;;  %v332_v49 = vpop.xlane.xlu1 %331  ;;  %v447_v53 = vpack.c.bf16 %v435_v15, %v434_v52  ;;  %v422_v27 = vpack.c.bf16 %v410_v14, %v409_v42 }
 0x158   :  { %v329_v30 = vpop.xlane.xlu0 %328  ;;  %v352_v2 = vadd.f32 %v332_v49, %v268_v26 }
 0x159   :  { %v351_v43 = vadd.f32 %v329_v30, %v265_v37  ;;  %787 = vmatmul.mubr.msk.bf16.gmra.mxu0 %vm50_vm0, %v447_v53  ;;  %805 = vmatmul.mubr.msk.bf16.gmra.mxu1 %vm50_vm0, %v422_v27 }
 0x15a   :  { %v368_v46 = vmul.f32 0.0625, %v352_v2 }
 0x15b   :  { %v367_v63 = vmul.f32 0.0625, %v351_v43  ;;  %v835_v47 = vpop.eup %834  ;;  %v274_v62 = vpop.xlane.xlu1 %273 }
 0x15c   :  { %v271_v50 = vpop.xlane.xlu0 %270  ;;  %v837_v4 = vpop.eup %836  ;;  %v384_v51 = vadd.f32 1e-05, %v368_v46  ;;  %v437_v28 = vmul.f32 %v835_v47, %v1199_v35  ;;  %v412_v25 = vmul.f32 %v835_v47, %v1196_v34 }
 0x15d   :  { %v383_v3 = vadd.f32 1e-05, %v367_v63  ;;  %v436_v13 = vmul.f32 %v837_v4, %v1205_v16  ;;  %v411_v29 = vmul.f32 %v837_v4, %v1202_v38 }
 0x15e   :  { %842 = vrsqrt.f32 %v384_v51 }
 0x15f   :  { %844 = vrsqrt.f32 %v383_v3  ;;  %v338_v56 = vpop.xlane.xlu1 %337  ;;  %v448_v45 = vpack.c.bf16 %v437_v28, %v436_v13  ;;  %v423_v54 = vpack.c.bf16 %v412_v25, %v411_v29 }
 0x160   :  { %v335_v55 = vpop.xlane.xlu0 %334  ;;  %v354_v60 = vadd.f32 %v338_v56, %v274_v62 }
 0x161   :  { %v353_v59 = vadd.f32 %v335_v55, %v271_v50  ;;  %790 = vmatprep.mubr.msk.bf16.mxu0 %vm50_vm0, %v448_v45  ;;  %808 = vmatprep.mubr.msk.bf16.mxu1 %vm50_vm0, %v423_v54 }
 0x162   :  { %v370_v57 = vmul.f32 0.0625, %v354_v60 }
 0x163   :  { %v369_v35 = vmul.f32 0.0625, %v353_v59  ;;  %v839_v58 = vpop.eup %838 }
 0x164   :  { %v841_v34 = vpop.eup %840  ;;  %v386_v61 = vadd.f32 1e-05, %v370_v57  ;;  %v439_v38 = vmul.f32 %v839_v58, %v1223_v12  ;;  %v414_v7 = vmul.f32 %v839_v58, %v1220_v8 }
 0x165   :  { %v385_v16 = vadd.f32 1e-05, %v369_v35  ;;  %v438_v10 = vmul.f32 %v841_v34, %v1229_v24  ;;  %v413_v11 = vmul.f32 %v841_v34, %v1226_v9 }
 0x166   :  { %846 = vrsqrt.f32 %v386_v61 }
 0x167   :  { %848 = vrsqrt.f32 %v385_v16  ;;  %v449_v18 = vpack.c.bf16 %v439_v38, %v438_v10  ;;  %v424_v19 = vpack.c.bf16 %v414_v7, %v413_v11 }
 0x169   :  { %791 = vmatmul.mubr.msk.bf16.gmra.mxu0 %vm50_vm0, %v449_v18  ;;  %809 = vmatmul.mubr.msk.bf16.gmra.mxu1 %vm50_vm0, %v424_v19 }
 0x16b   :  { %v843_v22 = vpop.eup %842 }
 0x16c   :  { %v845_v23 = vpop.eup %844  ;;  %v441_v20 = vmul.f32 %v843_v22, %v1253_v32  ;;  %v416_v12 = vmul.f32 %v843_v22, %v1250_v39 }
 0x16d   :  { %v440_v8 = vmul.f32 %v845_v23, %v1259_v33  ;;  %v415_v24 = vmul.f32 %v845_v23, %v1256_v36 }
 0x16f   :  { %v450_v17 = vpack.c.bf16 %v441_v20, %v440_v8  ;;  %v425_v9 = vpack.c.bf16 %v416_v12, %v415_v24 }
 0x171   :  { %794 = vmatprep.mubr.msk.bf16.mxu0 %vm50_vm0, %v450_v17  ;;  %812 = vmatprep.mubr.msk.bf16.mxu1 %vm50_vm0, %v425_v9 }
 0x173   :  { %v847_v5 = vpop.eup %846 }
 0x174   :  { %v849_v31 = vpop.eup %848  ;;  %v443_v21 = vmul.f32 %v847_v5, %v1277_v6  ;;  %v418_v26 = vmul.f32 %v847_v5, %v1274_v40 }
 0x175   :  { %v442_v32 = vmul.f32 %v849_v31, %v1283_v41  ;;  %v417_v39 = vmul.f32 %v849_v31, %v1280_v44 }
 0x177   :  { %v451_v37 = vpack.c.bf16 %v443_v21, %v442_v32  ;;  %v426_v33 = vpack.c.bf16 %v418_v26, %v417_v39 }
 0x179   :  { %795 = vmatmul.mubr.msk.bf16.gmra.mxu0 %vm50_vm0, %v451_v37  ;;  %813 = vmatmul.mubr.msk.bf16.gmra.mxu1 %vm50_vm0, %v426_v33 }
 0x209   :  { %v784_v36 = vpop.f32.mrf.mxu0  ;;  %v802_v0 = vpop.f32.mrf.mxu1 }
 0x20a   :  { %v648_v6 = vadd.f32 %v802_v0, %v784_v36 }
 0x20b   :  { %v515_v1 = vpop.f32.mrf.mxu0  ;;  %v639_v40 = vpop.f32.mrf.mxu1 }
 0x20c   :  { %v711_v41 = vadd.f32 %v1348_v48, %v648_v6  ;;  %v640_v15 = vadd.f32 %v639_v40, %v515_v1 }
 0x20d   :  { %v785_v44 = vpop.f32.mrf.mxu0  ;;  %v803_v14 = vpop.f32.mrf.mxu1 }
 0x20e   :  { %727 = vst [vmem:[%s1418_s4 + $0x10] sm:$0xff] %v711_v41  ;;  %v709_v52 = vadd.f32 %v1348_v48, %v640_v15  ;;  %v651_v42 = vadd.f32 %v803_v14, %v785_v44 }
 0x20f   :  { %v518_v49 = vpop.f32.mrf.mxu0  ;;  %v642_v30 = vpop.f32.mrf.mxu1 }
 0x210   :  { %725 = vst [vmem:[%s1418_s4] sm:$0xff] %v709_v52  ;;  %v712_v53 = vadd.f32 %v1348_v48, %v651_v42  ;;  %v643_v27 = vadd.f32 %v642_v30, %v518_v49 }
 0x212   :  { %728 = vst [vmem:[%s1418_s4 + $0x18] sm:$0xff] %v712_v53  ;;  %v710_v2 = vadd.f32 %v1348_v48, %v643_v27 }
 0x214   :  { %726 = vst [vmem:[%s1418_s4 + $0x8] sm:$0xff] %v710_v2 }
 0x219   :  { %v788_v43 = vpop.f32.mrf.mxu0  ;;  %v806_v46 = vpop.f32.mrf.mxu1 }
 0x21a   :  { %v664_v63 = vadd.f32 %v806_v46, %v788_v43 }
 0x21b   :  { %v531_v47 = vpop.f32.mrf.mxu0  ;;  %v655_v62 = vpop.f32.mrf.mxu1 }
 0x21c   :  { %v715_v50 = vadd.f32 %v1348_v48, %v664_v63  ;;  %v656_v4 = vadd.f32 %v655_v62, %v531_v47 }
 0x21d   :  { %v789_v51 = vpop.f32.mrf.mxu0  ;;  %v807_v3 = vpop.f32.mrf.mxu1 }
 0x21e   :  { %731 = vst [vmem:[%s1418_s4 + $0x30] sm:$0xff] %v715_v50  ;;  %v713_v28 = vadd.f32 %v1348_v48, %v656_v4  ;;  %v667_v25 = vadd.f32 %v807_v3, %v789_v51 }
 0x21f   :  { %v534_v13 = vpop.f32.mrf.mxu0  ;;  %v658_v29 = vpop.f32.mrf.mxu1 }
 0x220   :  { %729 = vst [vmem:[%s1418_s4 + $0x20] sm:$0xff] %v713_v28  ;;  %v716_v56 = vadd.f32 %v1348_v48, %v667_v25  ;;  %v659_v55 = vadd.f32 %v658_v29, %v534_v13 }
 0x222   :  { %732 = vst [vmem:[%s1418_s4 + $0x38] sm:$0xff] %v716_v56  ;;  %v714_v45 = vadd.f32 %v1348_v48, %v659_v55 }
 0x224   :  { %730 = vst [vmem:[%s1418_s4 + $0x28] sm:$0xff] %v714_v45 }
 0x229   :  { %v792_v54 = vpop.f32.mrf.mxu0  ;;  %v810_v60 = vpop.f32.mrf.mxu1 }
 0x22a   :  { %v680_v59 = vadd.f32 %v810_v60, %v792_v54 }
 0x22b   :  { %v547_v57 = vpop.f32.mrf.mxu0  ;;  %v671_v35 = vpop.f32.mrf.mxu1 }
 0x22c   :  { %v719_v58 = vadd.f32 %v1348_v48, %v680_v59  ;;  %v672_v34 = vadd.f32 %v671_v35, %v547_v57 }
 0x22d   :  { %v793_v61 = vpop.f32.mrf.mxu0  ;;  %v811_v16 = vpop.f32.mrf.mxu1 }
 0x22e   :  { %735 = vst [vmem:[%s1418_s4 + $0x50] sm:$0xff] %v719_v58  ;;  %v717_v38 = vadd.f32 %v1348_v48, %v672_v34  ;;  %v683_v7 = vadd.f32 %v811_v16, %v793_v61 }
 0x22f   :  { %v550_v10 = vpop.f32.mrf.mxu0  ;;  %v674_v11 = vpop.f32.mrf.mxu1 }
 0x230   :  { %733 = vst [vmem:[%s1418_s4 + $0x40] sm:$0xff] %v717_v38  ;;  %v720_v18 = vadd.f32 %v1348_v48, %v683_v7  ;;  %v675_v19 = vadd.f32 %v674_v11, %v550_v10 }
 0x232   :  { %736 = vst [vmem:[%s1418_s4 + $0x58] sm:$0xff] %v720_v18  ;;  %v718_v22 = vadd.f32 %v1348_v48, %v675_v19 }
 0x234   :  { %734 = vst [vmem:[%s1418_s4 + $0x48] sm:$0xff] %v718_v22 }
 0x239   :  { %v796_v23 = vpop.f32.mrf.mxu0  ;;  %v814_v20 = vpop.f32.mrf.mxu1 }
 0x23a   :  { %v696_v12 = vadd.f32 %v814_v20, %v796_v23 }
 0x23b   :  { %v563_v8 = vpop.f32.mrf.mxu0  ;;  %v687_v24 = vpop.f32.mrf.mxu1 }
 0x23c   :  { %v723_v17 = vadd.f32 %v1348_v48, %v696_v12  ;;  %v688_v9 = vadd.f32 %v687_v24, %v563_v8 }
 0x23d   :  { %v797_v5 = vpop.f32.mrf.mxu0  ;;  %v815_v31 = vpop.f32.mrf.mxu1 }
 0x23e   :  { %739 = vst [vmem:[%s1418_s4 + $0x70] sm:$0xff] %v723_v17  ;;  %v721_v21 = vadd.f32 %v1348_v48, %v688_v9  ;;  %v699_v26 = vadd.f32 %v815_v31, %v797_v5 }
 0x23f   :  { %v566_v32 = vpop.f32.mrf.mxu0  ;;  %v690_v39 = vpop.f32.mrf.mxu1 }
 0x240   :  { %737 = vst [vmem:[%s1418_s4 + $0x60] sm:$0xff] %v721_v21  ;;  %v724_v37 = vadd.f32 %v1348_v48, %v699_v26  ;;  %v691_v33 = vadd.f32 %v690_v39, %v566_v32 }
 0x242   :  { %740 = vst [vmem:[%s1418_s4 + $0x78] sm:$0xff] %v724_v37  ;;  %v722_v36 = vadd.f32 %v1348_v48, %v691_v33 }
 0x244   :  { %738 = vst [vmem:[%s1418_s4 + $0x68] sm:$0xff] %v722_v36 }

</bundles_post_ra>
